<compile_context>
chip_gen: v6e
topology: v6e:2x2x1
jax: 0.10.0
libtpu: 0.0.40
codegen_flags: <defaults>
</compile_context>

<pallas_src>
import functools

import jax
import jax.numpy as jnp
from jax.experimental import pallas as pl
from jax.experimental.pallas import tpu as pltpu


def _mlp_attention_kernel(x_ref, u_ref, len_ref, alpha_ref, attn_ref,
                          m_sc, l_sc, acc_sc, *, ns_static):
    """One (batch-tile, seq-chunk) step of the fused MLP-attention forward.

    x_ref:     [bt, Sk, H]  bf16  input chunk (batch-major, H on lanes)
    u_ref:     [1, H]       f32   fused projection u = proj_v.weight @ proj_w.weight
    len_ref:   [bt, 1]      int32 source lengths
    alpha_ref: [bt, S_pad]  f32   attention weights (out); also the resident
                                  raw-scores buffer across sequence chunks
    attn_ref:  [bt, 1, H]   f32   attended context (out)
    m_sc/l_sc: [bt, 1]      f32   online-softmax running max / denominator
    acc_sc:    [bt, 1, H]   f32   online-softmax weighted-sum accumulator
    """
    bt, sk, _H = x_ref.shape
    s_idx = pl.program_id(1)

    @pl.when(s_idx == 0)
    def _init():
        m_sc[...] = jnp.full(m_sc.shape, -jnp.inf, m_sc.dtype)
        l_sc[...] = jnp.zeros(l_sc.shape, l_sc.dtype)
        acc_sc[...] = jnp.zeros(acc_sc.shape, acc_sc.dtype)

    x = x_ref[...]                                       # [bt, Sk, H] bf16
    u = u_ref[...]                                       # [1, H] f32

    # scores[b, s] = sum_h x[b,s,h] * u[h]; bf16 x widens to f32 inside the
    # multiply and the lane-axis reduce lands directly in a lane-dense
    # [bt, Sk] (no reshape/transpose chain). The fused bias term (b . v) is
    # constant over s, cancels in the softmax, and has been dropped.
    scores = jnp.sum(x * u[None, :, :], axis=-1)         # [bt, Sk] f32

    # Source-length masking for this sequence chunk (create_src_lengths_mask
    # + masked_fill(-inf)); also masks the lane padding added in the wrapper.
    base = s_idx * sk
    pos = base + jax.lax.broadcasted_iota(jnp.int32, (bt, sk), 1)
    masked = jnp.where(pos < len_ref[...], scores, -jnp.inf)  # [bt, Sk] f32

    # Stash the raw masked scores in the resident alpha block; they are
    # normalized in one shot at the last sequence chunk.
    if ns_static == 1:
        alpha_ref[...] = masked
    else:
        start = pl.multiple_of(s_idx * sk, 128)          # Sk is a multiple of 128
        alpha_ref[:, pl.ds(start, sk)] = masked

    # Flash-style online softmax update for the attended-context accumulator.
    m_new = jnp.maximum(m_sc[...], jnp.max(masked, axis=-1, keepdims=True))
    corr = jnp.exp(m_sc[...] - m_new)                    # [bt, 1]
    p = jnp.exp(masked - m_new)                          # [bt, Sk] f32
    l_sc[...] = corr * l_sc[...] + jnp.sum(p, axis=-1, keepdims=True)
    acc_sc[...] = corr[:, :, None] * acc_sc[...] + jnp.einsum(
        "bqs,bsh->bqh", p.astype(x.dtype)[:, None, :], x,
        preferred_element_type=jnp.float32)              # [bt, 1, H] f32 (MXU)
    m_sc[...] = m_new

    @pl.when(s_idx == ns_static - 1)
    def _finalize():
        # Exact normalization (divide on the tiny [bt, 1] denominator).
        # NOTE: zero-length rows yield NaN, matching the PyTorch reference.
        inv_l = 1.0 / l_sc[...]                          # [bt, 1]
        alpha_ref[...] = jnp.exp(alpha_ref[...] - m_sc[...]) * inv_l
        attn_ref[...] = acc_sc[...] * inv_l[:, :, None]


def _round_up(a, m):
    return (a + m - 1) // m * m


def _tpu_vmem_capacity():
    try:
        info = pltpu.get_tpu_info()
        cap = getattr(info, "vmem_capacity_bytes", None)
        if cap:
            return int(cap)
    except Exception:
        pass
    return 64 * 1024 * 1024       # conservative fallback: v7x per-TC VMEM


def _pick_tiles(B, S_pad, H, x_itemsize, budget):
    """VMEM-budget-driven (batch tile, sequence chunk) selection."""

    def fits(bt, sk):
        x_blk = bt * sk * H * x_itemsize      # pipelined input block
        temp = bt * sk * H * 4                # f32 product temp of the scores reduce
        alpha = bt * S_pad * 4                # resident scores/alpha block
        small = bt * H * 4 * 4                # attn out + acc scratch + slack
        return 2 * x_blk + temp + 2 * alpha + small <= budget

    if B % 8 == 0:
        cand_bt = [d for d in range(8, B + 1, 8) if B % d == 0]
    else:
        cand_bt = [B]                          # sublane dim must be x8 or the full dim
    # Prefer >=2 batch steps so v7x's two TensorCores both get a share of the
    # "parallel" axis (single-TC chips are unaffected).
    pref_bt = [bt for bt in cand_bt if B // bt >= 2] or cand_bt

    # 1) largest batch tile that holds the full (padded) sequence
    for bt in sorted(pref_bt, reverse=True):
        if fits(bt, S_pad):
            return bt, S_pad
    # 2) otherwise tile the sequence: smallest batch tile, largest
    #    128-multiple chunk that divides S_pad and fits the budget
    bt = min(cand_bt)
    for sk in range(S_pad, 0, -128):
        if S_pad % sk == 0 and fits(bt, sk):
            return bt, sk
    return bt, 128


def mlp_attention(x, x_lengths, w, b, v, *, compute_dtype=jnp.bfloat16):
    """x: [S, B, H]; x_lengths: [B]; w: [A, H] (proj_w.weight);
    b: [A] (proj_w.bias); v: [1, A] (proj_v.weight).
    Returns (alpha [B, S], attn_x [B, H]) matching MLPAttentionNetwork.forward."""
    S, B, H = x.shape
    A = w.shape[0]

    w32 = jnp.asarray(w, jnp.float32).reshape(A, H)
    v32 = jnp.asarray(v, jnp.float32).reshape(A)
    # Host-side fusion of proj_w -> proj_v (no nonlinearity between them):
    #   scores = (x @ W^T + b) @ v^T = x @ (v @ W) + (b . v)
    # The scalar (b . v) is dropped: constant over the sequence, cancels in the
    # softmax. u is tiny, so it stays f32 for precision.
    u = (v32 @ w32).reshape(1, H)                         # [1, H] f32

    # Pad S to a multiple of 128 so alpha stores are lane-dense; the length
    # mask already covers the padded tail.
    S_pad = _round_up(S, 128)
    x_bsh = jnp.transpose(jnp.asarray(x, compute_dtype), (1, 0, 2))  # [B, S, H]
    if S_pad != S:
        x_bsh = jnp.pad(x_bsh, ((0, 0), (0, S_pad - S), (0, 0)))
    lens = jnp.asarray(x_lengths, jnp.int32).reshape(B, 1)

    # Chip-aware VMEM budgeting (128 MiB on v5e/v6e, 64 MiB on v7x).
    cap = _tpu_vmem_capacity()
    vmem_limit = int(min(96 * 1024 * 1024, (cap * 3) // 4))
    budget = max(vmem_limit - 8 * 1024 * 1024, vmem_limit // 2)
    bt, sk = _pick_tiles(B, S_pad, H, jnp.dtype(compute_dtype).itemsize, budget)
    nb, ns = B // bt, S_pad // sk

    kernel = functools.partial(_mlp_attention_kernel, ns_static=ns)

    alpha_pad, attn3 = pl.pallas_call(
        kernel,
        out_shape=(
            jax.ShapeDtypeStruct((B, S_pad), jnp.float32),
            jax.ShapeDtypeStruct((B, 1, H), jnp.float32),
        ),
        grid=(nb, ns),
        in_specs=[
            pl.BlockSpec((bt, sk, H), lambda i, s: (i, s, 0)),   # x chunk
            pl.BlockSpec((1, H), lambda i, s: (0, 0)),           # fused weight u
            pl.BlockSpec((bt, 1), lambda i, s: (i, 0)),          # lengths
        ],
        out_specs=(
            pl.BlockSpec((bt, S_pad), lambda i, s: (i, 0)),      # alpha (resident over s)
            pl.BlockSpec((bt, 1, H), lambda i, s: (i, 0, 0)),    # attn_x
        ),
        scratch_shapes=[
            pltpu.VMEM((bt, 1), jnp.float32),                    # running max
            pltpu.VMEM((bt, 1), jnp.float32),                    # running denom
            pltpu.VMEM((bt, 1, H), jnp.float32),                 # weighted-sum acc
        ],
        compiler_params=pltpu.CompilerParams(
            dimension_semantics=("parallel", "arbitrary"),
            vmem_limit_bytes=vmem_limit,
        ),
    )(x_bsh, u, lens)

    return alpha_pad[:, :S], attn3.reshape(B, H)


def mlp_attention_ref(x, x_lengths, w, b, v):
    """Pure-JAX f32 reference mirroring the (unfused) PyTorch forward."""
    S, B, H = x.shape
    flat = x.reshape(S * B, H)
    mlp = flat @ w.T + b
    scores = (mlp @ v.T).reshape(S, B).T                  # [B, S]
    mask = jnp.arange(S)[None, :] < x_lengths[:, None]
    masked = jnp.where(mask, scores, -jnp.inf)
    alpha = jax.nn.softmax(masked, axis=-1)               # [B, S]
    attn_x = jnp.sum(x * alpha.T[:, :, None], axis=0)     # [B, H]
    return alpha, attn_x


if __name__ == "__main__":
    # small shapes consistent with the module: seq=8, batch=2, hidden=32, attn=16
    S, B, H, A = 8, 2, 32, 16
    key = jax.random.PRNGKey(0)
    kx, kw, kb, kv = jax.random.split(key, 4)

    x = jax.random.normal(kx, (S, B, H), dtype=jnp.float32)
    # max length == seq_len (matches create_src_lengths_mask default)
    x_lengths = jnp.array([S, 5], dtype=jnp.int32)

    # deterministic synthetic parameters (nn.Linear shapes)
    w_proj = jax.random.normal(kw, (A, H), dtype=jnp.float32) * 0.1   # proj_w.weight
    b_proj = jax.random.normal(kb, (A,), dtype=jnp.float32) * 0.1     # proj_w.bias
    v_proj = jax.random.normal(kv, (1, A), dtype=jnp.float32) * 0.1   # proj_v.weight

    alpha, attn_x = mlp_attention(x, x_lengths, w_proj, b_proj, v_proj)
    jax.block_until_ready((alpha, attn_x))

    alpha_ref, attn_ref = mlp_attention_ref(x, x_lengths, w_proj, b_proj, v_proj)
    assert alpha.shape == (B, S) and attn_x.shape == (B, H)
    # tolerance accounts for the bf16 input cast (softmax/accumulation are f32)
    assert jnp.allclose(alpha, alpha_ref, atol=2e-2, rtol=2e-2)
    assert jnp.allclose(attn_x, attn_ref, atol=2e-2, rtol=2e-2)

    print("KERNEL_OK")
</pallas_src>

<mosaic_0001>
module attributes {stable_mosaic.version = 11 : i64} {
  func.func @_mlp_attention_kernel(%arg0: i32, %arg1: i32, %arg2: memref<2x128x32xbf16, #tpu.memory_space<vmem>>, %arg3: memref<1x32xf32, #tpu.memory_space<vmem>>, %arg4: memref<2x1xi32, #tpu.memory_space<vmem>>, %arg5: memref<2x128xf32, #tpu.memory_space<vmem>>, %arg6: memref<2x1x32xf32, #tpu.memory_space<vmem>>, %arg7: memref<2x1xf32, #tpu.memory_space<vmem>>, %arg8: memref<2x1xf32, #tpu.memory_space<vmem>>, %arg9: memref<2x1x32xf32, #tpu.memory_space<vmem>>) attributes {dimension_semantics = [#tpu.dimension_semantics<parallel>, #tpu.dimension_semantics<arbitrary>], iteration_bounds = array<i64: 1, 1>, scalar_prefetch = 0 : i64, scratch_operands = 3 : i64, tpu.core_type = #tpu.core_type<tc>, window_params = [{transform_indices = @transform_0, window_bounds = array<i64: 2, 128, 32>}, {pipeline_mode = #tpu.pipeline_mode<synchronous>, transform_indices = @transform_1, window_bounds = array<i64: 1, 32>}, {transform_indices = @transform_2, window_bounds = array<i64: 2, 1>}, {transform_indices = @transform_3, window_bounds = array<i64: 2, 128>}, {transform_indices = @transform_4, window_bounds = array<i64: 2, 1, 32>}]} {
    %c0_i32 = arith.constant 0 : i32
    %0 = arith.cmpi eq, %arg1, %c0_i32 : i32
    %1 = arith.extui %0 : i1 to i32
    %c0_i32_0 = arith.constant 0 : i32
    %2 = arith.cmpi ne, %1, %c0_i32_0 : i32
    scf.if %2 {
      %cst_31 = arith.constant 0xFF800000 : f32
      %49 = vector.broadcast %cst_31 : f32 to vector<2x1xf32>
      %c0_32 = arith.constant 0 : index
      %c0_33 = arith.constant 0 : index
      %50 = vector.load %arg7[%c0_32, %c0_33] : memref<2x1xf32, #tpu.memory_space<vmem>>, vector<2x1xf32>
      tpu.vector_store %arg7[%c0_32, %c0_33], %49 {strides = array<i32>} : memref<2x1xf32, #tpu.memory_space<vmem>>, vector<2x1xf32>,
      %cst_34 = arith.constant 0.000000e+00 : f32
      %51 = vector.broadcast %cst_34 : f32 to vector<2x1xf32>
      %c0_35 = arith.constant 0 : index
      %c0_36 = arith.constant 0 : index
      %52 = vector.load %arg8[%c0_35, %c0_36] : memref<2x1xf32, #tpu.memory_space<vmem>>, vector<2x1xf32>
      tpu.vector_store %arg8[%c0_35, %c0_36], %51 {strides = array<i32>} : memref<2x1xf32, #tpu.memory_space<vmem>>, vector<2x1xf32>,
      %cst_37 = arith.constant 0.000000e+00 : f32
      %53 = vector.broadcast %cst_37 : f32 to vector<2x1x32xf32>
      %c0_38 = arith.constant 0 : index
      %c0_39 = arith.constant 0 : index
      %c0_40 = arith.constant 0 : index
      %54 = vector.load %arg9[%c0_38, %c0_39, %c0_40] : memref<2x1x32xf32, #tpu.memory_space<vmem>>, vector<2x1x32xf32>
      tpu.vector_store %arg9[%c0_38, %c0_39, %c0_40], %53 {strides = array<i32>} : memref<2x1x32xf32, #tpu.memory_space<vmem>>, vector<2x1x32xf32>,
    } else {
    }
    %c0 = arith.constant 0 : index
    %c0_1 = arith.constant 0 : index
    %c0_2 = arith.constant 0 : index
    %3 = vector.load %arg2[%c0, %c0_1, %c0_2] : memref<2x128x32xbf16, #tpu.memory_space<vmem>>, vector<2x128x32xbf16>
    %c0_3 = arith.constant 0 : index
    %c0_4 = arith.constant 0 : index
    %4 = vector.load %arg3[%c0_3, %c0_4] : memref<1x32xf32, #tpu.memory_space<vmem>>, vector<1x32xf32>
    %5 = vector.shape_cast %4 : vector<1x32xf32> to vector<1x1x32xf32>
    %6 = arith.extf %3 : vector<2x128x32xbf16> to vector<2x128x32xf32>
    %7 = vector.broadcast %5 : vector<1x1x32xf32> to vector<2x128x32xf32>
    %8 = arith.mulf %6, %7 : vector<2x128x32xf32>
    %cst = arith.constant dense<0.000000e+00> : vector<2x128xf32>
    %9 = vector.multi_reduction <add>, %8, %cst [2] : vector<2x128x32xf32> to vector<2x128xf32>
    %c128_i32 = arith.constant 128 : i32
    %10 = arith.muli %arg1, %c128_i32 : i32
    %11 = tpu.iota {dimensions = array<i32: 1>} : vector<2x128xi32>
    %12 = vector.broadcast %10 : i32 to vector<2x128xi32>
    %13 = arith.addi %12, %11 : vector<2x128xi32>
    %c0_5 = arith.constant 0 : index
    %c0_6 = arith.constant 0 : index
    %14 = vector.load %arg4[%c0_5, %c0_6] : memref<2x1xi32, #tpu.memory_space<vmem>>, vector<2x1xi32>
    %15 = vector.broadcast %14 : vector<2x1xi32> to vector<2x128xi32>
    %16 = arith.cmpi slt, %13, %15 : vector<2x128xi32>
    %cst_7 = arith.constant 0xFF800000 : f32
    %17 = vector.broadcast %cst_7 : f32 to vector<2x128xf32>
    %18 = arith.select %16, %9, %17 : vector<2x128xi1>, vector<2x128xf32>
    %c0_8 = arith.constant 0 : index
    %c0_9 = arith.constant 0 : index
    %19 = vector.load %arg5[%c0_8, %c0_9] : memref<2x128xf32, #tpu.memory_space<vmem>>, vector<2x128xf32>
    tpu.vector_store %arg5[%c0_8, %c0_9], %18 {strides = array<i32>} : memref<2x128xf32, #tpu.memory_space<vmem>>, vector<2x128xf32>,
    %c0_10 = arith.constant 0 : index
    %c0_11 = arith.constant 0 : index
    %20 = vector.load %arg7[%c0_10, %c0_11] : memref<2x1xf32, #tpu.memory_space<vmem>>, vector<2x1xf32>
    %cst_12 = arith.constant dense<0xFF800000> : vector<2xf32>
    %21 = vector.multi_reduction <maximumf>, %18, %cst_12 [1] : vector<2x128xf32> to vector<2xf32>
    %22 = vector.shape_cast %21 : vector<2xf32> to vector<2x1xf32>
    %23 = arith.maximumf %20, %22 : vector<2x1xf32>
    %c0_13 = arith.constant 0 : index
    %c0_14 = arith.constant 0 : index
    %24 = vector.load %arg7[%c0_13, %c0_14] : memref<2x1xf32, #tpu.memory_space<vmem>>, vector<2x1xf32>
    %25 = arith.subf %24, %23 : vector<2x1xf32>
    %26 = math.exp %25 : vector<2x1xf32>
    %27 = vector.broadcast %23 : vector<2x1xf32> to vector<2x128xf32>
    %28 = arith.subf %18, %27 : vector<2x128xf32>
    %29 = math.exp %28 : vector<2x128xf32>
    %c0_15 = arith.constant 0 : index
    %c0_16 = arith.constant 0 : index
    %30 = vector.load %arg8[%c0_15, %c0_16] : memref<2x1xf32, #tpu.memory_space<vmem>>, vector<2x1xf32>
    %31 = arith.mulf %26, %30 : vector<2x1xf32>
    %cst_17 = arith.constant dense<0.000000e+00> : vector<2xf32>
    %32 = vector.multi_reduction <add>, %29, %cst_17 [1] : vector<2x128xf32> to vector<2xf32>
    %33 = vector.shape_cast %32 : vector<2xf32> to vector<2x1xf32>
    %34 = arith.addf %31, %33 : vector<2x1xf32>
    %c0_18 = arith.constant 0 : index
    %c0_19 = arith.constant 0 : index
    %35 = vector.load %arg8[%c0_18, %c0_19] : memref<2x1xf32, #tpu.memory_space<vmem>>, vector<2x1xf32>
    tpu.vector_store %arg8[%c0_18, %c0_19], %34 {strides = array<i32>} : memref<2x1xf32, #tpu.memory_space<vmem>>, vector<2x1xf32>,
    %36 = vector.shape_cast %26 : vector<2x1xf32> to vector<2x1x1xf32>
    %c0_20 = arith.constant 0 : index
    %c0_21 = arith.constant 0 : index
    %c0_22 = arith.constant 0 : index
    %37 = vector.load %arg9[%c0_20, %c0_21, %c0_22] : memref<2x1x32xf32, #tpu.memory_space<vmem>>, vector<2x1x32xf32>
    %38 = vector.broadcast %36 : vector<2x1x1xf32> to vector<2x1x32xf32>
    %39 = arith.mulf %38, %37 : vector<2x1x32xf32>
    %40 = arith.truncf %29 : vector<2x128xf32> to vector<2x128xbf16>
    %41 = vector.shape_cast %40 : vector<2x128xbf16> to vector<2x1x128xbf16>
    "tpu.trace_start"() <{level = 10 : i32, message = "bqs,bsh->bqh"}> : () -> ()
    %cst_23 = arith.constant dense<0.000000e+00> : vector<2x1x32xf32>
    %42 = tpu.matmul %41, %3, %cst_23 {dimension_numbers = #tpu.dot_dimension_numbers<[2], [1], [1], [2], [0, 0, 0, 1, 1, 2], [0], [0]>} : vector<2x1x128xbf16>, vector<2x128x32xbf16>, vector<2x1x32xf32> -> vector<2x1x32xf32>
    "tpu.trace_stop"() : () -> ()
    %43 = arith.addf %39, %42 : vector<2x1x32xf32>
    %c0_24 = arith.constant 0 : index
    %c0_25 = arith.constant 0 : index
    %c0_26 = arith.constant 0 : index
    %44 = vector.load %arg9[%c0_24, %c0_25, %c0_26] : memref<2x1x32xf32, #tpu.memory_space<vmem>>, vector<2x1x32xf32>
    tpu.vector_store %arg9[%c0_24, %c0_25, %c0_26], %43 {strides = array<i32>} : memref<2x1x32xf32, #tpu.memory_space<vmem>>, vector<2x1x32xf32>,
    %c0_27 = arith.constant 0 : index
    %c0_28 = arith.constant 0 : index
    %45 = vector.load %arg7[%c0_27, %c0_28] : memref<2x1xf32, #tpu.memory_space<vmem>>, vector<2x1xf32>
    tpu.vector_store %arg7[%c0_27, %c0_28], %23 {strides = array<i32>} : memref<2x1xf32, #tpu.memory_space<vmem>>, vector<2x1xf32>,
    %c0_i32_29 = arith.constant 0 : i32
    %46 = arith.cmpi eq, %arg1, %c0_i32_29 : i32
    %47 = arith.extui %46 : i1 to i32
    %c0_i32_30 = arith.constant 0 : i32
    %48 = arith.cmpi ne, %47, %c0_i32_30 : i32
    scf.if %48 {
      %c0_31 = arith.constant 0 : index
      %c0_32 = arith.constant 0 : index
      %49 = vector.load %arg8[%c0_31, %c0_32] : memref<2x1xf32, #tpu.memory_space<vmem>>, vector<2x1xf32>
      %cst_33 = arith.constant 1.000000e+00 : f32
      %50 = vector.broadcast %cst_33 : f32 to vector<2x1xf32>
      %51 = arith.divf %50, %49 : vector<2x1xf32>
      %c0_34 = arith.constant 0 : index
      %c0_35 = arith.constant 0 : index
      %52 = vector.load %arg5[%c0_34, %c0_35] : memref<2x128xf32, #tpu.memory_space<vmem>>, vector<2x128xf32>
      %c0_36 = arith.constant 0 : index
      %c0_37 = arith.constant 0 : index
      %53 = vector.load %arg7[%c0_36, %c0_37] : memref<2x1xf32, #tpu.memory_space<vmem>>, vector<2x1xf32>
      %54 = vector.broadcast %53 : vector<2x1xf32> to vector<2x128xf32>
      %55 = arith.subf %52, %54 : vector<2x128xf32>
      %56 = math.exp %55 : vector<2x128xf32>
      %57 = vector.broadcast %51 : vector<2x1xf32> to vector<2x128xf32>
      %58 = arith.mulf %56, %57 : vector<2x128xf32>
      %c0_38 = arith.constant 0 : index
      %c0_39 = arith.constant 0 : index
      %59 = vector.load %arg5[%c0_38, %c0_39] : memref<2x128xf32, #tpu.memory_space<vmem>>, vector<2x128xf32>
      tpu.vector_store %arg5[%c0_38, %c0_39], %58 {strides = array<i32>} : memref<2x128xf32, #tpu.memory_space<vmem>>, vector<2x128xf32>,
      %c0_40 = arith.constant 0 : index
      %c0_41 = arith.constant 0 : index
      %c0_42 = arith.constant 0 : index
      %60 = vector.load %arg9[%c0_40, %c0_41, %c0_42] : memref<2x1x32xf32, #tpu.memory_space<vmem>>, vector<2x1x32xf32>
      %61 = vector.shape_cast %51 : vector<2x1xf32> to vector<2x1x1xf32>
      %62 = vector.broadcast %61 : vector<2x1x1xf32> to vector<2x1x32xf32>
      %63 = arith.mulf %60, %62 : vector<2x1x32xf32>
      %c0_43 = arith.constant 0 : index
      %c0_44 = arith.constant 0 : index
      %c0_45 = arith.constant 0 : index
      %64 = vector.load %arg6[%c0_43, %c0_44, %c0_45] : memref<2x1x32xf32, #tpu.memory_space<vmem>>, vector<2x1x32xf32>
      tpu.vector_store %arg6[%c0_43, %c0_44, %c0_45], %63 {strides = array<i32>} : memref<2x1x32xf32, #tpu.memory_space<vmem>>, vector<2x1x32xf32>,
    } else {
    }
    return
  }
  func.func @transform_0(%arg0: i32, %arg1: i32) -> (i32, i32, i32) {
    %c0_i32 = arith.constant 0 : i32
    %c0_i32_0 = arith.constant 0 : i32
    return %arg0, %arg1, %c0_i32 : i32, i32, i32
  }
  func.func @transform_1(%arg0: i32, %arg1: i32) -> (i32, i32) {
    %c0_i32 = arith.constant 0 : i32
    %c0_i32_0 = arith.constant 0 : i32
    %c0_i32_1 = arith.constant 0 : i32
    return %c0_i32, %c0_i32_0 : i32, i32
  }
  func.func @transform_2(%arg0: i32, %arg1: i32) -> (i32, i32) {
    %c0_i32 = arith.constant 0 : i32
    %c0_i32_0 = arith.constant 0 : i32
    return %arg0, %c0_i32 : i32, i32
  }
  func.func @transform_3(%arg0: i32, %arg1: i32) -> (i32, i32) {
    %c0_i32 = arith.constant 0 : i32
    %c0_i32_0 = arith.constant 0 : i32
    return %arg0, %c0_i32 : i32, i32
  }
  func.func @transform_4(%arg0: i32, %arg1: i32) -> (i32, i32, i32) {
    %c0_i32 = arith.constant 0 : i32
    %c0_i32_0 = arith.constant 0 : i32
    %c0_i32_1 = arith.constant 0 : i32
    return %arg0, %c0_i32, %c0_i32_0 : i32, i32, i32
  }
}

</mosaic_0001>

<bundles_post_ra>
// kernel: tpu_custom_call.1
= control target key start
LH: loop header
LB: loop body
LE: loop exit
PB: predicated region body
PF: predicated region fallthrough
CT: control target
= control target key end

     0   :  { %10 = vsyncpa [#allocation6], 0  ;;  %v996_v9 = vmov 0   ;;  %vm132_vm0 = vcmask 261120   ;;  %s1442_s0 = inlined_call_operand.vmem [shape: bf16[2,128,32], index: 0, kind: input, shape index: {}]   ;;  %s1443_s1 = inlined_call_operand.vmem [shape: f32[1,32], index: 1, kind: input, shape index: {}]   ;;  %s1444_s2 = inlined_call_operand.vmem [shape: s32[2,1], index: 2, kind: input, shape index: {}]   ;;  %s1445_s3 = inlined_call_operand.hbm [shape: f32[2,128], index: 3, kind: output, shape index: {0}]   ;;  %s1446_s4 = inlined_call_operand.hbm [shape: f32[2,1,32], index: 4, kind: output, shape index: {1}]  }
   0x1   :  { %v1033_v0 = vld [vmem:[%s1442_s0 + $0x40] sm:$0xff]   ;;  %v1052_v7 = vld [vmem:[%s1442_s0 + $0x48] sm:$0xff]   ;;  %926 = vset.pattern.permute.xlu0 %v996_v9  ;;  %927 = vset.pattern.permute.xlu1 %v996_v9 }
   0x2   :  { %1450 = vst [vmem:[#allocation11_spill] sm:$0xff] %v1033_v0  ;;  %v1038_v1 = vld [vmem:[%s1443_s1] ss:$0 sm:$0xff]  ;;  %v78_v3 = vunpack.c.l.bf16 %v1033_v0  ;;  %v79_v5 = vunpack.c.h.bf16 %v1033_v0  ;;  %1452 = vst [vmem:[#allocation13_spill] sm:$0xff] %v1052_v7  ;;  %v1057_v8 = vld [vmem:[%s1442_s0 + $0x8] sm:$0xff]   ;;  %v80_v10 = vunpack.c.l.bf16 %v1052_v7  ;;  %v81_v18 = vunpack.c.h.bf16 %v1052_v7 }
   0x3   :  { %v1043_v2 = vld [vmem:[%s1442_s0] sm:$0xff]   ;;  %v64_v11 = vunpack.c.l.bf16 %v1057_v8  ;;  %v65_v19 = vunpack.c.h.bf16 %v1057_v8 }
   0x4   :  { %1451 = vst [vmem:[#allocation12_spill] sm:$0xff] %v1043_v2  ;;  %v62_v4 = vunpack.c.l.bf16 %v1043_v2  ;;  %v63_v6 = vunpack.c.h.bf16 %v1043_v2  ;;  %v116_v12 = vmul.f32 %v1038_v1, %v78_v3  ;;  %v117_v14 = vmul.f32 %v1038_v1, %v79_v5 }
   0x5   :  { %v118_v22 = vmul.f32 %v1038_v1, %v80_v10  ;;  %v102_v23 = vmul.f32 %v1038_v1, %v64_v11 }
   0x6   :  { %v100_v13 = vmul.f32 %v1038_v1, %v62_v4  ;;  %v101_v15 = vmul.f32 %v1038_v1, %v63_v6  ;;  %v181_v16 = vsel %vm132_vm0, %v116_v12, 0.0  ;;  %v184_v20 = vsel %vm132_vm0, %v117_v14, 0.0 }
   0x7   :  { %182 = vadd.xlane.f32.xlu1 %v181_v16 }
   0x8   :  { %v133_v17 = vsel %vm132_vm0, %v100_v13, 0.0  ;;  %v136_v21 = vsel %vm132_vm0, %v101_v15, 0.0 }
   0x9   :  { %134 = vadd.xlane.f32.xlu0 %v133_v17 }
   0xa   :  { %11 = vsyncpa [#allocation8], 0  ;;  %v1076_v24 = vld [vmem:[%s1442_s0 + $0x50] sm:$0xff]   ;;  %v119_v26 = vmul.f32 %v1038_v1, %v81_v18  ;;  %v103_v27 = vmul.f32 %v1038_v1, %v65_v19  ;;  %v187_v28 = vsel %vm132_vm0, %v118_v22, 0.0  ;;  %v139_v29 = vsel %vm132_vm0, %v102_v23, 0.0  ;;  %v1098_v38 = vld [vmem:[%s1442_s0 + $0x58] sm:$0xff]  }
   0xb   :  { %v1081_v25 = vld [vmem:[%s1442_s0 + $0x10] sm:$0xff]   ;;  %185 = vadd.xlane.f32.xlu1 %v184_v20  ;;  %v82_v30 = vunpack.c.l.bf16 %v1076_v24  ;;  %v83_v36 = vunpack.c.h.bf16 %v1076_v24  ;;  %v1103_v39 = vld [vmem:[%s1442_s0 + $0x18] sm:$0xff]   ;;  %v84_v40 = vunpack.c.l.bf16 %v1098_v38  ;;  %v85_v46 = vunpack.c.h.bf16 %v1098_v38  ;;  %v1120_v52 = vld [vmem:[%s1442_s0 + $0x60] sm:$0xff]   ;;  %s1002_s23 = smov [#allocation7]  }
   0xc   :  { %v66_v31 = vunpack.c.l.bf16 %v1081_v25  ;;  %v190_v32 = vsel %vm132_vm0, %v119_v26, 0.0  ;;  %v142_v33 = vsel %vm132_vm0, %v103_v27, 0.0  ;;  %v67_v37 = vunpack.c.h.bf16 %v1081_v25  ;;  %v1125_v53 = vld [vmem:[%s1442_s0 + $0x20] sm:$0xff]   ;;  %v1142_v5 = vld [vmem:[%s1442_s0 + $0x68] sm:$0xff]   ;;  %v1169_v22 = vld [vmem:[%s1442_s0 + $0x30] sm:$0xff]   ;;  %s826_s24 = sshll.u32 %s1002_s23, 4  ;;  %s827_s24 = int_to_ptr.vmem [resolvable:$true] %s826_s24 }
   0xd   :  { %137 = vadd.xlane.f32.xlu0 %v136_v21  ;;  %v120_v34 = vmul.f32 %v1038_v1, %v82_v30  ;;  %v68_v41 = vunpack.c.l.bf16 %v1103_v39  ;;  %v121_v44 = vmul.f32 %v1038_v1, %v83_v36  ;;  %v69_v47 = vunpack.c.h.bf16 %v1103_v39  ;;  %v1147_v6 = vld [vmem:[%s1442_s0 + $0x28] sm:$0xff]   ;;  %v1164_v21 = vld [vmem:[%s1442_s0 + $0x70] sm:$0xff]  }
   0xe   :  { %v104_v35 = vmul.f32 %v1038_v1, %v66_v31  ;;  %v105_v45 = vmul.f32 %v1038_v1, %v67_v37  ;;  %v122_v50 = vmul.f32 %v1038_v1, %v84_v40  ;;  %v123_v54 = vmul.f32 %v1038_v1, %v85_v46  ;;  %v1186_v37 = vld [vmem:[%s1442_s0 + $0x78] sm:$0xff]  }
   0xf   :  { %188 = vadd.xlane.f32.xlu1 %v187_v28  ;;  %v193_v42 = vsel %vm132_vm0, %v120_v34, 0.0  ;;  %v196_v48 = vsel %vm132_vm0, %v121_v44, 0.0  ;;  %v106_v51 = vmul.f32 %v1038_v1, %v68_v41  ;;  %v86_v55 = vunpack.c.l.bf16 %v1120_v52  ;;  %v1191_v40 = vld [vmem:[%s1442_s0 + $0x38] sm:$0xff]  }
  0x10   :  { %v145_v43 = vsel %vm132_vm0, %v104_v35, 0.0  ;;  %v148_v49 = vsel %vm132_vm0, %v105_v45, 0.0  ;;  %v199_v56 = vsel %vm132_vm0, %v122_v50, 0.0  ;;  %v107_v58 = vmul.f32 %v1038_v1, %v69_v47 }
  0x11   :  { %140 = vadd.xlane.f32.xlu0 %v139_v29  ;;  %v151_v57 = vsel %vm132_vm0, %v106_v51, 0.0  ;;  %v70_v59 = vunpack.c.l.bf16 %v1125_v53  ;;  %v202_v60 = vsel %vm132_vm0, %v123_v54, 0.0  ;;  %v124_v61 = vmul.f32 %v1038_v1, %v86_v55 }
  0x12   :  { %v154_v62 = vsel %vm132_vm0, %v107_v58, 0.0  ;;  %v87_v3 = vunpack.c.h.bf16 %v1120_v52  ;;  %v71_v4 = vunpack.c.h.bf16 %v1125_v53  ;;  %v88_v9 = vunpack.c.l.bf16 %v1142_v5 }
  0x13   :  { %191 = vadd.xlane.f32.xlu1 %v190_v32  ;;  %v108_v63 = vmul.f32 %v1038_v1, %v70_v59  ;;  %v72_v10 = vunpack.c.l.bf16 %v1147_v6  ;;  %v205_v11 = vsel %vm132_vm0, %v124_v61, 0.0  ;;  %v89_v16 = vunpack.c.h.bf16 %v1142_v5  ;;  %v234_v61 = vld [vmem:[%s1444_s2] sm:$0x3]  ;;  %s1001_s2 = smov [#allocation5]  }
  0x14   :  { %v125_v13 = vmul.f32 %v1038_v1, %v87_v3  ;;  %v109_v14 = vmul.f32 %v1038_v1, %v71_v4  ;;  %v126_v15 = vmul.f32 %v1038_v1, %v88_v9  ;;  %v73_v20 = vunpack.c.h.bf16 %v1147_v6  ;;  %s817_s1 = sshll.u32 %s1001_s2, 4  ;;  %s818_s1 = int_to_ptr.vmem [resolvable:$true] %s817_s1 }
  0x15   :  { %143 = vadd.xlane.f32.xlu0 %v142_v33  ;;  %v157_v12 = vsel %vm132_vm0, %v108_v63, 0.0  ;;  %v110_v19 = vmul.f32 %v1038_v1, %v72_v10  ;;  %v127_v23 = vmul.f32 %v1038_v1, %v89_v16  ;;  %v90_v26 = vunpack.c.l.bf16 %v1164_v21  ;;  %s952_s25 = scalar_lea.vmem %s818_s1, 32  ;;  %p957_p1 = scmp.lt.s32.totalorder %s818_s1, %s818_s1 }
  0x16   :  { %v208_v17 = vsel %vm132_vm0, %v125_v13, 0.0  ;;  %v160_v18 = vsel %vm132_vm0, %v109_v14, 0.0  ;;  %v211_v27 = vsel %vm132_vm0, %v126_v15, 0.0  ;;  %v111_v29 = vmul.f32 %v1038_v1, %v73_v20  ;;  %p953_p0 = scmp.ne.s32.totalorder %s818_s1, %s952_s25  ;;  %p958_p2 = scmp.lt.s32.totalorder %s952_s25, %s952_s25 }
  0x17   :  { %194 = vadd.xlane.f32.xlu1 %v193_v42  ;;  %v163_v28 = vsel %vm132_vm0, %v110_v19, 0.0  ;;  %v74_v30 = vunpack.c.l.bf16 %v1169_v22  ;;  %v214_v31 = vsel %vm132_vm0, %v127_v23, 0.0  ;;  %v128_v32 = vmul.f32 %v1038_v1, %v90_v26 }
  0x18   :  { %v166_v33 = vsel %vm132_vm0, %v111_v29, 0.0  ;;  %v91_v35 = vunpack.c.h.bf16 %v1164_v21  ;;  %v75_v36 = vunpack.c.h.bf16 %v1169_v22  ;;  %v92_v41 = vunpack.c.l.bf16 %v1186_v37  ;;  %p959_p3 = por %p958_p2, %p957_p1 }
  0x19   :  { %146 = vadd.xlane.f32.xlu0 %v145_v43  ;;  %v112_v34 = vmul.f32 %v1038_v1, %v74_v30  ;;  %v76_v42 = vunpack.c.l.bf16 %v1191_v40  ;;  %v217_v43 = vsel %vm132_vm0, %v128_v32, 0.0  ;;  %v77_v54 = vunpack.c.h.bf16 %v1191_v40 }
  0x1a   :  { %v129_v45 = vmul.f32 %v1038_v1, %v91_v35  ;;  %v113_v46 = vmul.f32 %v1038_v1, %v75_v36  ;;  %v130_v47 = vmul.f32 %v1038_v1, %v92_v41  ;;  %v230_v26 = vlaneseq  ;;  %p960_p4 = pnand %p959_p3, %p953_p0 }
  0x1b   :  { %197 = vadd.xlane.f32.xlu1 %v196_v48  ;;  %v169_v44 = vsel %vm132_vm0, %v112_v34, 0.0  ;;  %v93_v48 = vunpack.c.h.bf16 %v1186_v37  ;;  %v114_v51 = vmul.f32 %v1038_v1, %v76_v42  ;;  %v115_v58 = vmul.f32 %v1038_v1, %v77_v54 }
  0x1c   :  { %v172_v50 = vsel %vm132_vm0, %v113_v46, 0.0  ;;  %v223_v55 = vsel %vm132_vm0, %v130_v47, 0.0  ;;  %v1254_v29 = vand.u32 127, %v230_v26  ;;  %v1256_v30 = vshrl.u32 %v230_v26, 7 }
  0x1d   :  { %149 = vadd.xlane.f32.xlu0 %v148_v49  ;;  %v220_v49 = vsel %vm132_vm0, %v129_v45, 0.0  ;;  %vm280_vm1 = vcmask 130112   ;;  %vm287_vm2 = vcmask 195712   ;;  %vm294_vm3 = vcmask 261312  }
  0x1e   :  { %v282_v32 = vadd.s32 4294967280, %v1254_v29  ;;  %v296_v34 = vadd.s32 4294967264, %v1254_v29  ;;  %v303_v41 = vadd.s32 4294967256, %v1254_v29  ;;  %v273_v42 = vsub.s32 %v1254_v29, %v1256_v30 }
  0x1f   :  { %200 = vadd.xlane.f32.xlu1 %v199_v56  ;;  %v175_v56 = vsel %vm132_vm0, %v114_v51, 0.0  ;;  %v324_v47 = vadd.s32 4294967232, %v1254_v29  ;;  %vm301_vm4 = vcmask 326912   ;;  %v338_v51 = vadd.s32 4294967216, %v1254_v29 }
  0x20   :  { %v285_v46 = vsub.s32 %v282_v32, %v1256_v30  ;;  %vm308_vm5 = vcmask 392512   ;;  %vm315_vm6 = vcmask 458112   ;;  %vm322_vm7 = vcmask 523712  }
  0x21   :  { %152 = vadd.xlane.f32.xlu0 %v151_v57  ;;  %v131_v57 = vmul.f32 %v1038_v1, %v93_v48  ;;  %v331_v48 = vadd.s32 4294967224, %v1254_v29  ;;  %v1291_v26 = vsub.s32 %v324_v47, %v1256_v30  ;;  %v366_v32 = vadd.s32 4294967184, %v1254_v29 }
  0x22   :  { %vm329_vm8 = vcmask 589312   ;;  %vm336_vm9 = vcmask 654912   ;;  %vm343_vm10 = vcmask 720512   ;;  %vm350_vm11 = vcmask 786112  }
  0x23   :  { %203 = vadd.xlane.f32.xlu1 %v202_v60  ;;  %v226_v59 = vsel %vm132_vm0, %v131_v57, 0.0  ;;  %v178_v60 = vsel %vm132_vm0, %v115_v58, 0.0  ;;  %v345_v57 = vadd.s32 4294967208, %v1254_v29  ;;  %v352_v58 = vadd.s32 4294967200, %v1254_v29 }
  0x24   :  { %vm357_vm12 = vcmask 851712   ;;  %vm364_vm13 = vcmask 917312   ;;  %vm371_vm14 = vcmask 982912   ;;  %vm378_vm15 = vcmask 1048512  }
  0x25   :  { %155 = vadd.xlane.f32.xlu0 %v154_v62  ;;  %v1311_v7 = vsub.s32 %v345_v57, %v1256_v30  ;;  %vm459_vm0 = vcmask 1041409  }
  0x27   :  { %206 = vadd.xlane.f32.xlu1 %v205_v11 }
  0x29   :  { %158 = vadd.xlane.f32.xlu0 %v157_v12 }
  0x2b   :  { %209 = vadd.xlane.f32.xlu1 %v208_v17 }
  0x2d   :  { %161 = vadd.xlane.f32.xlu0 %v160_v18 }
  0x2f   :  { %212 = vadd.xlane.f32.xlu1 %v211_v27 }
  0x31   :  { %164 = vadd.xlane.f32.xlu0 %v163_v28 }
  0x33   :  { %215 = vadd.xlane.f32.xlu1 %v214_v31  ;;  %v275_v31 = vadd.s32 4294967288, %v1254_v29 }
  0x35   :  { %167 = vadd.xlane.f32.xlu0 %v166_v33  ;;  %v289_v33 = vadd.s32 4294967272, %v1254_v29  ;;  %v278_v45 = vsub.s32 %v275_v31, %v1256_v30  ;;  %v1294_v31 = vsub.s32 %v331_v48, %v1256_v30 }
  0x37   :  { %218 = vadd.xlane.f32.xlu1 %v217_v43  ;;  %v310_v43 = vadd.s32 4294967248, %v1254_v29 }
  0x39   :  { %170 = vadd.xlane.f32.xlu0 %v169_v44  ;;  %v317_v44 = vadd.s32 4294967240, %v1254_v29 }
  0x3b   :  { %221 = vadd.xlane.f32.xlu1 %v220_v49  ;;  %v292_v49 = vsub.s32 %v289_v33, %v1256_v30  ;;  %v373_v33 = vadd.s32 4294967176, %v1254_v29 }
  0x3d   :  { %173 = vadd.xlane.f32.xlu0 %v172_v50  ;;  %v299_v50 = vsub.s32 %v296_v34, %v1256_v30  ;;  %v1328_v57 = vsub.s32 %v373_v33, %v1256_v30 }
  0x3f   :  { %224 = vadd.xlane.f32.xlu1 %v223_v55 }
  0x41   :  { %176 = vadd.xlane.f32.xlu0 %v175_v56  ;;  %v306_v56 = vsub.s32 %v303_v41, %v1256_v30 }
  0x43   :  { %227 = vadd.xlane.f32.xlu1 %v226_v59  ;;  %v313_v59 = vsub.s32 %v310_v43, %v1256_v30 }
  0x45   :  { %179 = vadd.xlane.f32.xlu0 %v178_v60  ;;  %v1287_v60 = vsub.s32 %v317_v44, %v1256_v30  ;;  %v1302_v44 = vsub.s32 %v338_v51, %v1256_v30 }
  0x5b   :  { %236 = vperm.xlu0 %926, %v234_v61   ;;  %v359_v61 = vadd.s32 4294967192, %v1254_v29 }
  0x5d   :  { %v1320_v51 = vsub.s32 %v359_v61, %v1256_v30 }
  0x90   :  { %v1214_v62 = vpop.xlane.xlu1 %182 }
  0x91   :  { %v383_v34 = vrot.slane %v1214_v62, %v273_v42  ;;  %v1314_v62 = vsub.s32 %v352_v58, %v1256_v30 }
  0x92   :  { %v1216_v63 = vpop.xlane.xlu0 %134 }
  0x94   :  { %v1218_v3 = vpop.xlane.xlu1 %185 }
  0x95   :  { %v387_v41 = vrot.slane %v1218_v3, %v278_v45  ;;  %v274_v3 = vrot.slane %v1216_v63, %v273_v42 }
  0x96   :  { %v1220_v1 = vpop.xlane.xlu0 %137 }
  0x97   :  { %v279_v43 = vrot.slane %v1220_v1, %v278_v45  ;;  %v388_v63 = vsel %vm280_vm1, %v387_v41, %v383_v34 }
  0x98   :  { %v1222_v4 = vpop.xlane.xlu1 %188 }
  0x99   :  { %v392_v48 = vrot.slane %v1222_v4, %v285_v46 }
  0x9a   :  { %v1224_v9 = vpop.xlane.xlu0 %140 }
  0x9b   :  { %v286_v2 = vrot.slane %v1224_v9, %v285_v46  ;;  %v1325_v46 = vsub.s32 %v366_v32, %v1256_v30 }
  0x9c   :  { %v1226_v10 = vpop.xlane.xlu1 %191 }
  0x9d   :  { %v397_v1 = vrot.slane %v1226_v10, %v292_v49  ;;  %v281_v10 = vsel %vm280_vm1, %v279_v43, %v274_v3  ;;  %vm465_vm1 = vcmask 1041408  }
  0x9e   :  { %v1228_v11 = vpop.xlane.xlu0 %143 }
  0x9f   :  { %v293_v45 = vrot.slane %v1228_v11, %v292_v49 }
  0xa0   :  { %v1230_v12 = vpop.xlane.xlu1 %194 }
  0xa1   :  { %v402_v4 = vrot.slane %v1230_v12, %v299_v50 }
  0xa2   :  { %v1232_v13 = vpop.xlane.xlu0 %146 }
  0xa3   :  { %v300_v9 = vrot.slane %v1232_v13, %v299_v50  ;;  %v393_v13 = vsel %vm287_vm2, %v392_v48, %v388_v63  ;;  %v288_v50 = vsel %vm287_vm2, %v286_v2, %v281_v10 }
  0xa4   :  { %v1234_v14 = vpop.xlane.xlu1 %197  ;;  %v398_v32 = vsel %vm294_vm3, %v397_v1, %v393_v13  ;;  %v295_v33 = vsel %vm294_vm3, %v293_v45, %v288_v50  ;;  %vm23_vm3 = vcmask 1024  }
  0xa5   :  { %v407_v11 = vrot.slane %v1234_v14, %v306_v56  ;;  %v302_v2 = vsel %vm301_vm4, %v300_v9, %v295_v33 }
  0xa6   :  { %v1236_v15 = vpop.xlane.xlu0 %149 }
  0xa7   :  { %v307_v42 = vrot.slane %v1236_v15, %v306_v56  ;;  %v403_v56 = vsel %vm301_vm4, %v402_v4, %v398_v32  ;;  %vm26_vm4 = vcmask 253952  }
  0xa8   :  { %v1238_v16 = vpop.xlane.xlu1 %200 }
  0xa9   :  { %v412_v58 = vrot.slane %v1238_v16, %v313_v59  ;;  %v309_v34 = vsel %vm308_vm5, %v307_v42, %v302_v2 }
  0xaa   :  { %v1240_v17 = vpop.xlane.xlu0 %152 }
  0xab   :  { %v314_v61 = vrot.slane %v1240_v17, %v313_v59  ;;  %v408_v59 = vsel %vm308_vm5, %v407_v11, %v403_v56  ;;  %v998_v56 = vmov 0.0   ;;  %vm1000_vm5 = vmmov 0  }
  0xac   :  { %v1242_v18 = vpop.xlane.xlu1 %203  ;;  %v413_v43 = vsel %vm315_vm6, %v412_v58, %v408_v59  ;;  %877 = vmatprep.subr.bf16.mxu0 %v998_v56  ;;  %25 = vst.msk [vmem:[#allocation3] sm:$0x3] %vm23_vm3, %v998_v56  ;;  %897 = vmatprep.subr.bf16.mxu1 %v998_v56 }
  0xad   :  { %v417_v14 = vrot.slane %v1242_v18, %v1287_v60  ;;  %v316_v48 = vsel %vm315_vm6, %v314_v61, %v309_v34  ;;  %878 = vmatpush3.bf16.msra.mxu0 %v1191_v40  ;;  %898 = vmatpush3.bf16.msra.mxu1 %v1186_v37  ;;  %27 = vst.msk [vmem:[#allocation4] sm:$0x1] %vm26_vm4, %v998_v56  ;;  %28 = vst.msk [vmem:[#allocation4 + $0x1] sm:$0x1] %vm26_vm4, %v998_v56  ;;  %v1454_v34 = vld [vmem:[#allocation12_spill] sm:$0xff] }
  0xae   :  { %v1244_v19 = vpop.xlane.xlu0 %155  ;;  %879 = vmatprep.subr.bf16.mxu0 %v998_v56  ;;  %899 = vmatprep.subr.bf16.mxu1 %v998_v56 }
  0xaf   :  { %v321_v15 = vrot.slane %v1244_v19, %v1287_v60  ;;  %893 = vmatprep.mubr.msk.bf16.mxu0 %vm1000_vm5, %v998_v56  ;;  %913 = vmatprep.mubr.msk.bf16.mxu1 %vm1000_vm5, %v998_v56 }
  0xb0   :  { %v1246_v20 = vpop.xlane.xlu1 %206 }
  0xb1   :  { %v422_v16 = vrot.slane %v1246_v20, %v1291_v26  ;;  %v323_v3 = vsel %vm322_vm7, %v321_v15, %v316_v48  ;;  %v997_v15 = vmov -inf   ;;  %880 = vmatpush3.bf16.msra.mxu0 %v1169_v22  ;;  %900 = vmatpush3.bf16.msra.mxu1 %v1164_v21  ;;  %v999_v22 = vmov 1966171168  }
  0xb2   :  { %v1248_v23 = vpop.xlane.xlu0 %158  ;;  %24 = vst.msk [vmem:[#allocation2] sm:$0x3] %vm23_vm3, %v997_v15  ;;  %881 = vmatprep.subr.bf16.mxu0 %v998_v56  ;;  %901 = vmatprep.subr.bf16.mxu1 %v998_v56  ;;  %v491_v37 = vunpack.c.l.s4 %v999_v22 }
  0xb3   :  { %v328_v17 = vrot.slane %v1248_v23, %v1291_v26  ;;  %v418_v26 = vsel %vm322_vm7, %v417_v14, %v413_v43 }
  0xb4   :  { %v1250_v27 = vpop.xlane.xlu1 %209  ;;  %v492_v21 = vunpack.c.0.s8 %v491_v37 }
  0xb5   :  { %v427_v18 = vrot.slane %v1250_v27, %v1294_v31  ;;  %v330_v1 = vsel %vm329_vm8, %v328_v17, %v323_v3  ;;  %882 = vmatpush3.bf16.msra.mxu0 %v1147_v6  ;;  %902 = vmatpush3.bf16.msra.mxu1 %v1142_v5 }
  0xb6   :  { %v1252_v28 = vpop.xlane.xlu0 %161  ;;  %883 = vmatprep.subr.bf16.mxu0 %v998_v56  ;;  %903 = vmatprep.subr.bf16.mxu1 %v998_v56 }
  0xb7   :  { %v335_v19 = vrot.slane %v1252_v28, %v1294_v31  ;;  %v423_v31 = vsel %vm329_vm8, %v422_v16, %v418_v26 }
  0xb8   :  { %v1262_v35 = vpop.xlane.xlu1 %212 }
  0xb9   :  { %v432_v20 = vrot.slane %v1262_v35, %v1302_v44  ;;  %v337_v45 = vsel %vm336_vm9, %v335_v19, %v330_v1  ;;  %884 = vmatpush3.bf16.msra.mxu0 %v1125_v53  ;;  %904 = vmatpush3.bf16.msra.mxu1 %v1120_v52  ;;  %v495_v53 = vsub.s32 %v492_v21, %v1256_v30  ;;  %v481_v1 = vld [vmem:[#allocation3] sm:$0x3] }
  0xba   :  { %v1264_v36 = vpop.xlane.xlu0 %164  ;;  %885 = vmatprep.subr.bf16.mxu0 %v998_v56  ;;  %905 = vmatprep.subr.bf16.mxu1 %v998_v56 }
  0xbb   :  { %v342_v23 = vrot.slane %v1264_v36, %v1302_v44  ;;  %v428_v44 = vsel %vm336_vm9, %v427_v18, %v423_v31 }
  0xbc   :  { %v1278_v54 = vpop.xlane.xlu1 %215 }
  0xbd   :  { %v437_v27 = vrot.slane %v1278_v54, %v1311_v7  ;;  %v344_v63 = vsel %vm343_vm10, %v342_v23, %v337_v45  ;;  %886 = vmatpush3.bf16.msra.mxu0 %v1103_v39  ;;  %906 = vmatpush3.bf16.msra.mxu1 %v1098_v38  ;;  %v1453_v38 = vld [vmem:[#allocation13_spill] sm:$0xff]  ;;  %v1423_v23 = vsub.s32 0, %v1256_v30 }
  0xbe   :  { %v1280_v55 = vpop.xlane.xlu0 %167  ;;  %887 = vmatprep.subr.bf16.mxu0 %v998_v56  ;;  %907 = vmatprep.subr.bf16.mxu1 %v998_v56 }
  0xbf   :  { %v349_v28 = vrot.slane %v1280_v55, %v1311_v7  ;;  %v433_v55 = vsel %vm343_vm10, %v432_v20, %v428_v44 }
  0xc0   :  { %v1304_v0 = vpop.xlane.xlu1 %218 }
  0xc1   :  { %v442_v35 = vrot.slane %v1304_v0, %v1314_v62  ;;  %888 = vmatpush3.bf16.msra.mxu0 %v1081_v25  ;;  %908 = vmatpush3.bf16.msra.mxu1 %v1076_v24  ;;  %v1455_v25 = vld [vmem:[#allocation11_spill] sm:$0xff] }
  0xc2   :  { %v1306_v47 = vpop.xlane.xlu0 %170  ;;  %889 = vmatprep.subr.bf16.mxu0 %v998_v56  ;;  %909 = vmatprep.subr.bf16.mxu1 %v998_v56 }
  0xc3   :  { %v356_v36 = vrot.slane %v1306_v47, %v1314_v62  ;;  %v438_v47 = vsel %vm350_vm11, %v437_v27, %v433_v55  ;;  %v351_v62 = vsel %vm350_vm11, %v349_v28, %v344_v63 }
  0xc4   :  { %v222_v49 = vpop.xlane.xlu1 %221 }
  0xc5   :  { %v447_v4 = vrot.slane %v222_v49, %v1320_v51  ;;  %v358_v49 = vsel %vm357_vm12, %v356_v36, %v351_v62  ;;  %890 = vmatpush3.bf16.msra.mxu0 %v1057_v8  ;;  %910 = vmatpush3.bf16.msra.mxu1 %v1453_v38 }
  0xc6   :  { %v174_v12 = vpop.xlane.xlu0 %173  ;;  %891 = vmatprep.subr.bf16.mxu0 %v998_v56  ;;  %911 = vmatprep.subr.bf16.mxu1 %v998_v56 }
  0xc7   :  { %v363_v54 = vrot.slane %v174_v12, %v1320_v51  ;;  %v443_v51 = vsel %vm357_vm12, %v442_v35, %v438_v47  ;;  %v512_v47 = vld [vmem:[#allocation4] sm:$0x1] }
  0xc8   :  { %v225_v60 = vpop.xlane.xlu1 %224  ;;  %v448_v12 = vsel %vm364_vm13, %v447_v4, %v443_v51 }
  0xc9   :  { %v452_v10 = vrot.slane %v225_v60, %v1325_v46  ;;  %v365_v13 = vsel %vm364_vm13, %v363_v54, %v358_v49  ;;  %892 = vmatpush3.bf16.msra.mxu0 %v1454_v34  ;;  %912 = vmatpush3.bf16.msra.mxu1 %v1455_v25 }
  0xca   :  { %v177_v41 = vpop.xlane.xlu0 %176 }
  0xcb   :  { %v370_v0 = vrot.slane %v177_v41, %v1325_v46  ;;  %v453_v50 = vsel %vm371_vm14, %v452_v10, %v448_v12 }
  0xcc   :  { %v228_v9 = vpop.xlane.xlu1 %227 }
  0xcd   :  { %v457_v11 = vrot.slane %v228_v9, %v1328_v57  ;;  %v372_v46 = vsel %vm371_vm14, %v370_v0, %v365_v13 }
  0xce   :  { %v180_v7 = vpop.xlane.xlu0 %179 }
  0xcf   :  { %v377_v42 = vrot.slane %v180_v7, %v1328_v57  ;;  %v458_v61 = vsel %vm378_vm15, %v457_v11, %v453_v50  ;;  %v513_v11 = vld [vmem:[#allocation4 + $0x1] sm:$0x1] }
  0xd1   :  { %v379_v58 = vsel %vm378_vm15, %v377_v42, %v372_v46 }
  0xd2   :  { %v460_v33 = vsel %vm459_vm0, %v458_v61, %v379_v58 }
  0xd6   :  { %v237_v32 = vpop.permute.xlu0 %236 }
  0xd7   :  { %vm238_vm2 = vcmp.lt.s32.totalorder %v1254_v29, %v237_v32  ;;  %v464_v29 = vld [vmem:[#allocation2] sm:$0x3] }
  0xd8   :  { %v1393_v57 = vsel %vm238_vm2, %v460_v33, -inf }
  0xd9   :  { %463 = vst [vmem:[#allocation5] sm:$0x3] %v1393_v57  ;;  %v466_v14 = vsel %vm465_vm1, %v1393_v57, -inf }
  0xda   :  { %467 = vmax.xlane.f32.xlu1 %v466_v14 }
  0xe0   :  { %v750_v14 = vld [vmem:[#allocation5] sm:$0x3] }
 0x163   :  { %v468_v2 = vpop.xlane.xlu1 %467 }
 0x164   :  { %v469_v16 = vmax.f32 %v464_v29, %v468_v2 }
 0x166   :  { %v470_v17 = vsub.f32 %v464_v29, %v469_v16  ;;  %743 = vst.msk [vmem:[#allocation2] sm:$0x3] %vm23_vm3, %v469_v16  ;;  %475 = vperm.xlu1 %927, %v469_v16  }
 0x168   :  { %v471_v40 = vmul.f32 1.442695, %v470_v17 }
 0x16a   :  { %944 = vpow2.f32 %v471_v40 }
 0x16d   :  { %v751_v59 = vld [vmem:[#allocation2] sm:$0x3] }
 0x16e   :  { %754 = vperm.xlu0 %926, %v751_v59  }
 0x177   :  { %v945_v52 = vpop.eup %944 }
 0x178   :  { %v496_v39 = vrot.slane %v945_v52, %v495_v53  ;;  %v482_v35 = vmul.f32 %v945_v52, %v481_v1 }
 0x17a   :  { %v504_v5 = vrot.slane %v496_v39, %v495_v53  ;;  %v497_v6 = vcombine.high %v496_v39, %v496_v39 }
 0x17c   :  { %515 = vperm.xlu0 %926, %v504_v5   ;;  %v511_v18 = vrot.slane %v497_v6, %v495_v53 }
 0x180   :  { %523 = vperm.xlu0 %926, %v511_v18  }
 0x1e1   :  { %v476_v24 = vpop.permute.xlu1 %475 }
 0x1e2   :  { %v478_v8 = vsub.f32 %v1393_v57, %v476_v24 }
 0x1e4   :  { %v479_v19 = vmul.f32 1.442695, %v478_v8 }
 0x1e6   :  { %946 = vpow2.f32 %v479_v19 }
 0x1e9   :  { %v755_v55 = vpop.permute.xlu0 %754 }
 0x1ea   :  { %v757_v15 = vsub.f32 %v750_v14, %v755_v55 }
 0x1ec   :  { %v758_v56 = vmul.f32 1.442695, %v757_v15 }
 0x1f3   :  { %v947_v60 = vpop.eup %946 }
 0x1f4   :  { %v483_v41 = vsel %vm465_vm1, %v947_v60, 0.0  ;;  %v532_v43 = vpack.c.bf16 %v947_v60, %v947_v60 }
 0x1f5   :  { %484 = vadd.xlane.f32.xlu1 %v483_v41 }
 0x1f6   :  { %v540_v48 = vrot.slane %v532_v43, %v495_v53 }
 0x1f7   :  { %v516_v63 = vpop.permute.xlu0 %515 }
 0x1f8   :  { %v547_v20 = vrot.slane %v540_v48, %v495_v53  ;;  %v521_v0 = vrot.slane %v516_v63, %v1423_v23 }
 0x1fa   :  { %v842_v26 = vpack.i.b16 %v547_v20, %v547_v20  ;;  %v549_v3 = vunpack.i.h.s16 %v547_v20  ;;  %v530_v42 = vmul.f32 %v521_v0, %v512_v47 }
 0x1fb   :  { %v524_v10 = vpop.permute.xlu0 %523 }
 0x1fc   :  { %v554_v27 = vrot.slane %v842_v26, %v1423_v23  ;;  %v644_v28 = vpack.i.b16 %v549_v3, %v549_v3  ;;  %v529_v62 = vrot.slane %v524_v10, %v1423_v23 }
 0x1fe   :  { %894 = vmatmul.mubr.bf16.vlgmr.msra.gmra.mxu0 %v554_v27  ;;  %v648_v31 = vrot.slane %v644_v28, %v1423_v23  ;;  %v531_v12 = vmul.f32 %v529_v62, %v513_v11 }
 0x200   :  { %914 = vmatmul.mubr.bf16.vlgmr.msra.gmra.mxu1 %v648_v31 }
 0x27e   :  { %v485_v36 = vpop.xlane.xlu1 %484 }
 0x27f   :  { %v486_v44 = vadd.f32 %v485_v36, %v482_v35 }
 0x281   :  { %488 = vst.msk [vmem:[#allocation3] sm:$0x3] %vm23_vm3, %v486_v44 }
 0x288   :  { %v747_v45 = vld [vmem:[#allocation3] sm:$0x3] }
 0x289   :  { %948 = vrcp.f32 %v747_v45 }
 0x28a   :  { %950 = vpow2.f32 %v758_v56 }
 0x296   :  { %v949_v4 = vpop.eup %948 }
 0x297   :  { %v775_v30 = vrot.slane %v949_v4, %v495_v53  ;;  %v951_v37 = vpop.eup %950 }
 0x299   :  { %v783_v54 = vrot.slane %v775_v30, %v495_v53  ;;  %v776_v9 = vcombine.high %v775_v30, %v775_v30 }
 0x29b   :  { %792 = vperm.xlu0 %926, %v783_v54   ;;  %v790_v7 = vrot.slane %v776_v9, %v495_v53 }
 0x29d   :  { %800 = vperm.xlu1 %927, %v790_v7  }
 0x29f   :  { %762 = vperm.xlu0 %926, %v949_v4  }
 0x2be   :  { %v638_v51 = vpop.f32.mrf.mxu0 }
 0x2bf   :  { %v738_v49 = vadd.f32 %v638_v51, %v530_v42 }
 0x2c0   :  { %v895_v13 = vpop.f32.mrf.mxu0  ;;  %v732_v50 = vpop.f32.mrf.mxu1 }
 0x2c1   :  { %741 = vst.msk [vmem:[#allocation4] sm:$0x1] %vm26_vm4, %v738_v49  ;;  %v739_v46 = vadd.f32 %v732_v50, %v531_v12 }
 0x2c2   :  { %v641_v58 = vpop.f32.mrf.mxu0  ;;  %v915_v61 = vpop.f32.mrf.mxu1 }
 0x2c3   :  { %742 = vst.msk [vmem:[#allocation4 + $0x1] sm:$0x1] %vm26_vm4, %v739_v46 }
 0x2c4   :  { %v896_v32 = vpop.f32.mrf.mxu0  ;;  %v735_v33 = vpop.f32.mrf.mxu1 }
 0x2c6   :  { %v916_v57 = vpop.f32.mrf.mxu1 }
 0x2c8   :  { %v767_v16 = vld [vmem:[#allocation4] sm:$0x1] }
 0x2ca   :  { %v768_v59 = vld [vmem:[#allocation4 + $0x1] sm:$0x1] }
 0x316   :  { %v793_v29 = vpop.permute.xlu0 %792 }
 0x317   :  { %v798_v2 = vrot.slane %v793_v29, %v1423_v23 }
 0x318   :  { %v801_v17 = vpop.permute.xlu1 %800 }
 0x319   :  { %v807_v40 = vmul.f32 %v798_v2, %v767_v16  ;;  %v806_v22 = vrot.slane %v801_v17, %v1423_v23 }
 0x31a   :  { %v763_v21 = vpop.permute.xlu0 %762 }
 0x31b   :  { %809 = vst.msk [vmem:[#allocation7] sm:$0x1] %vm26_vm4, %v807_v40  ;;  %v808_v53 = vmul.f32 %v806_v22, %v768_v59  ;;  %v765_v52 = vmul.f32 %v951_v37, %v763_v21 }
 0x31d   :  { %810 = vst.msk [vmem:[#allocation7 + $0x1] sm:$0x1] %vm26_vm4, %v808_v53  ;;  %766 = vst [vmem:[#allocation5] sm:$0x3] %v765_v52 }
 0x31e   :  { %963 = shalt.err (!%p960_p4)
}
 0x31f   :  { %820 = dma.vmem_to_hbm [thread:$0]  %s818_s1, 32, %s1445_s3, [#allocation6]  }
 0x320   :  { %s972_s28 = scalar_lea.vmem %s827_s24, 32  ;;  %p977_p6 = scmp.lt.s32.totalorder %s827_s24, %s827_s24 }
 0x321   :  { %p973_p5 = scmp.ne.s32.totalorder %s827_s24, %s972_s28  ;;  %p978_p7 = scmp.lt.s32.totalorder %s972_s28, %s972_s28 }
 0x323   :  { %p979_p8 = por %p978_p7, %p977_p6 }
 0x325   :  { %p980_p9 = pnand %p979_p8, %p973_p5 }
 0x327   :  { %983 = shalt.err (!%p980_p9)
}
 0x328   :  { %s1003_s29 = smov 16   ;;  %s1004_s30 = smov 1  }
 0x329   :  { %832 = dma.vmem_to_hbm [thread:$0]  %s827_s24, 32, %s1446_s4, [#allocation8], %s1003_s29, %s1003_s29, %s1004_s30  }
 0x32a   :  { %992 = dma.done.wait [#allocation6], 32  }
 0x32b   :  { %993 = vsyncadd [#allocation6], 4294967264 }
 0x32c   :  { %994 = dma.done.wait [#allocation8], 32  }
 0x32d   :  { %995 = vsyncadd [#allocation8], 4294967264 }
 0x32e   :  { %839 = vsyncpa [#allocation6], 1 }
 0x32f   :  { %840 = vsyncpa [#allocation8], 1 }

</bundles_post_ra>
